<compile_context>
chip_gen: v7x
topology: tpu7x:2x2x1
jax: 0.10.0
libtpu: 0.0.40
codegen_flags: <defaults>
</compile_context>

<pallas_src>
import jax
import jax.numpy as jnp
import numpy as np
from jax.experimental import pallas as pl
from jax.experimental.pallas import tpu as pltpu


def augru_kernel(x_ref, h_ref, att_ref,
                 wgx_ref, wgh_ref, bg_ref,
                 wcx_ref, wch_ref, bc_ref,
                 out_ref):
    h = h_ref[...]                               # [tT, H] f32 (elementwise dtype)
    att = att_ref[...]                           # [tT, 1] f32
    mm_dtype = wcx_ref.dtype                     # f32 or bf16 MXU operands
    x = x_ref[...].astype(mm_dtype)              # [tT, E] (already bf16 on fast path)

    # Fused update/reset gates: one [tT, 2] projection (col 0 = update,
    # col 1 = reset) instead of two separate lane-reduction passes.
    g = (jnp.dot(x, wgx_ref[...], preferred_element_type=jnp.float32)
         + jnp.dot(h.astype(mm_dtype), wgh_ref[...],
                   preferred_element_type=jnp.float32))
    u = att * jax.nn.sigmoid(g[:, 0:1] + bg_ref[0])   # attention-scaled update
    r = jax.nn.sigmoid(g[:, 1:2] + bg_ref[1])         # reset

    # Candidate state: split-weight matmuls (no lane-axis concatenation).
    cand = (jnp.dot(x, wcx_ref[...], preferred_element_type=jnp.float32)
            + jnp.dot((h * r).astype(mm_dtype), wch_ref[...],
                      preferred_element_type=jnp.float32)
            + bc_ref[...])
    tilde_h = jnp.tanh(cand)                          # [tT, H]

    # h' = (1-u)*h + u*~h, rewritten to save one full-tile multiply.
    out_ref[...] = h + u * (tilde_h - h)


def _lane_pad(n: int) -> int:
    return ((n + 127) // 128) * 128


def _sub_pad(n: int) -> int:
    return ((n + 7) // 8) * 8


def _vmem_estimate(tile_t: int, E: int, H: int, act_bytes: int, w_bytes: int) -> int:
    """Rough VMEM footprint: double-buffered activation streams + resident weights.
    Narrow blocks (att [.,1], wgx/wgh [.,2]) pad to 128 lanes; bc pads to 8 sublanes."""
    act = 2 * tile_t * (_lane_pad(E) * act_bytes       # x (bf16 on fast path)
                        + _lane_pad(H) * 4             # h (f32)
                        + 128 * 4                      # att pads to 128 lanes
                        + _lane_pad(H) * 4)            # out (f32)
    wts = (_sub_pad(E) * 128 * w_bytes                 # wgx [E,2] -> 128 lanes
           + _sub_pad(H) * 128 * w_bytes               # wgh [H,2] -> 128 lanes
           + _sub_pad(E) * _lane_pad(H) * w_bytes      # wc_x [E,H]
           + _sub_pad(H) * _lane_pad(H) * w_bytes      # wc_h [H,H]
           + 8 * _lane_pad(H) * 4)                     # bc [1,H]
    return act + wts


def _pick_tile_t(T: int, E: int, H: int, act_bytes: int, w_bytes: int,
                 *, sub: int = 8, budget: int = 40 * 1024 * 1024) -> int:
    """Pick the largest time tile that (a) divides T, (b) is a multiple of the
    sublane granularity `sub` (16 when x streams as bf16), (c) leaves >= 2 grid
    steps whenever possible (v7x megacore + pipelining), and (d) fits a
    conservative VMEM budget (v7x has only 64 MiB per TensorCore)."""
    cap = min(512, T // 2) if T >= 2 * sub else T
    for cand in (512, 256, 128, 64, 32, 16, 8):
        if cand > cap or cand % sub or T % cand:
            continue
        if _vmem_estimate(cand, E, H, act_bytes, w_bytes) > budget:
            continue
        return cand
    # TODO(synk): pad/mask ragged T instead of falling back to one big block.
    return T


def augru_cell(x, h, att, wu, bu, wr, br, wc, bc, *,
               tile_t=None, matmul_in_bf16=False, in_place_h=False):
    """x:[T,E], h:[T,H], att:[T,1]; wu/wr:[1,E+H], bu/br:[1,1], wc:[E+H,H], bc:[1,H].

    matmul_in_bf16: stream x and run both MXU projections with bf16 operands
    (f32 accumulate, f32 elementwise math). Recommended default on v5e.
    in_place_h: alias the h input with the output (caller must treat h as donated).
    """
    T, E = x.shape
    H = h.shape[1]
    assert wc.shape == (E + H, H)

    act_bytes = 2 if matmul_in_bf16 else 4
    w_bytes = 2 if matmul_in_bf16 else 4
    if tile_t is None:
        tile_t = _pick_tile_t(T, E, H, act_bytes, w_bytes,
                              sub=16 if matmul_in_bf16 else 8)
    assert T % tile_t == 0, "T must be divisible by tile_t"

    # Split the [*, E+H] weights so the kernel never concatenates along the
    # lane axis, and stack the two 1-unit gates into a single [., 2] projection.
    wgx = jnp.concatenate([wu[:, :E], wr[:, :E]], axis=0).T          # [E, 2]
    wgh = jnp.concatenate([wu[:, E:], wr[:, E:]], axis=0).T          # [H, 2]
    bg = jnp.concatenate([bu.reshape(-1), br.reshape(-1)])           # [2] -> SMEM
    wcx = wc[:E, :]                                                  # [E, H]
    wch = wc[E:, :]                                                  # [H, H]
    if matmul_in_bf16:
        # bf16 MXU operands + bf16 x streaming; f32 accumulate/elementwise.
        x = x.astype(jnp.bfloat16)
        wgx = wgx.astype(jnp.bfloat16)
        wgh = wgh.astype(jnp.bfloat16)
        wcx = wcx.astype(jnp.bfloat16)
        wch = wch.astype(jnp.bfloat16)

    resident = pl.Buffered(1)   # constant index map -> single-buffered, VMEM-resident
    grid = (T // tile_t,)
    in_specs = [
        pl.BlockSpec((tile_t, E), lambda i: (i, 0)),                        # x stream
        pl.BlockSpec((tile_t, H), lambda i: (i, 0)),                        # h stream
        pl.BlockSpec((tile_t, 1), lambda i: (i, 0)),                        # att stream
        pl.BlockSpec((E, 2), lambda i: (0, 0), pipeline_mode=resident),     # wgx
        pl.BlockSpec((H, 2), lambda i: (0, 0), pipeline_mode=resident),     # wgh
        pl.BlockSpec(memory_space=pltpu.MemorySpace.SMEM),                  # bg scalars
        pl.BlockSpec((E, H), lambda i: (0, 0), pipeline_mode=resident),     # wc_x
        pl.BlockSpec((H, H), lambda i: (0, 0), pipeline_mode=resident),     # wc_h
        pl.BlockSpec((1, H), lambda i: (0, 0), pipeline_mode=resident),     # bc
    ]
    out_specs = pl.BlockSpec((tile_t, H), lambda i: (i, 0))

    # Explicit (clamped) VMEM limit: estimate * 2 headroom, never above 60 MiB
    # so it stays legal on v7x's 64 MiB per-TC VMEM.
    vmem_est = _vmem_estimate(tile_t, E, H, act_bytes, w_bytes)
    vmem_limit = int(min(max(2 * vmem_est, 32 * 1024 * 1024), 60 * 1024 * 1024))

    return pl.pallas_call(
        augru_kernel,
        out_shape=jax.ShapeDtypeStruct((T, H), jnp.float32),
        grid_spec=pltpu.PrefetchScalarGridSpec(
            num_scalar_prefetch=0,
            grid=grid,
            in_specs=in_specs,
            out_specs=out_specs,
        ),
        compiler_params=pltpu.CompilerParams(
            dimension_semantics=("parallel",),     # disjoint output tiles -> safe
            vmem_limit_bytes=vmem_limit),
        input_output_aliases={1: 0} if in_place_h else {},
    )(x, h, att, wgx, wgh, bg, wcx, wch, bc)


def augru_cell_ref(x, h, att, wu, bu, wr, br, wc, bc):
    """Pure-JAX reference matching the PyTorch forward."""
    xh = jnp.concatenate([x, h], axis=-1)
    u = jax.nn.sigmoid(xh @ wu.T + bu)          # [T, 1]
    u = att * u
    r = jax.nn.sigmoid(xh @ wr.T + br)          # [T, 1]
    xhr = jnp.concatenate([x, h * r], axis=-1)
    tilde_h = jnp.tanh(xhr @ wc + bc)           # [T, H]
    return (1.0 - u) * h + u * tilde_h


if __name__ == "__main__":
    T, E, H = 64, 32, 32
    IH = E + H

    key = jax.random.PRNGKey(0)
    keys = jax.random.split(key, 9)

    x = jax.random.normal(keys[0], (T, E), dtype=jnp.float32)
    h = jax.random.normal(keys[1], (T, H), dtype=jnp.float32)
    att = jax.nn.sigmoid(jax.random.normal(keys[2], (T, 1), dtype=jnp.float32))

    # Linear-style init: gate weights [1, E+H], candidate weight [E+H, H].
    scale = 1.0 / np.sqrt(IH)
    wu = jax.random.uniform(keys[3], (1, IH), jnp.float32, -scale, scale)
    bu = jax.random.uniform(keys[4], (1, 1), jnp.float32, -scale, scale)
    wr = jax.random.uniform(keys[5], (1, IH), jnp.float32, -scale, scale)
    br = jax.random.uniform(keys[6], (1, 1), jnp.float32, -scale, scale)
    wc = jax.random.uniform(keys[7], (IH, H), jnp.float32, -scale, scale)
    bc = jax.random.uniform(keys[8], (1, H), jnp.float32, -scale, scale)

    ref = augru_cell_ref(x, h, att, wu, bu, wr, br, wc, bc)

    # Exact path: f32 MXU operands (tile_t=32 -> grid of 2 parallel steps).
    out = jax.block_until_ready(augru_cell(x, h, att, wu, bu, wr, br, wc, bc))
    np.testing.assert_allclose(np.asarray(out), np.asarray(ref),
                               rtol=1e-5, atol=1e-5)

    # Fast path: bf16 x streaming + bf16 MXU operands for both projections
    # (f32 accumulate + f32 elementwise); recommended default on v5e.
    out_bf16 = jax.block_until_ready(
        augru_cell(x, h, att, wu, bu, wr, br, wc, bc, matmul_in_bf16=True))
    np.testing.assert_allclose(np.asarray(out_bf16), np.asarray(ref),
                               rtol=2e-2, atol=2e-2)

    print("KERNEL_OK")
</pallas_src>

<mosaic_0001>
module attributes {stable_mosaic.version = 11 : i64} {
  func.func @augru_kernel(%arg0: i32, %arg1: memref<32x32xf32, #tpu.memory_space<vmem>>, %arg2: memref<32x32xf32, #tpu.memory_space<vmem>>, %arg3: memref<32x1xf32, #tpu.memory_space<vmem>>, %arg4: memref<32x2xf32, #tpu.memory_space<vmem>>, %arg5: memref<32x2xf32, #tpu.memory_space<vmem>>, %arg6: memref<2xf32, #tpu.memory_space<smem>>, %arg7: memref<32x32xf32, #tpu.memory_space<vmem>>, %arg8: memref<32x32xf32, #tpu.memory_space<vmem>>, %arg9: memref<1x32xf32, #tpu.memory_space<vmem>>, %arg10: memref<32x32xf32, #tpu.memory_space<vmem>>) attributes {dimension_semantics = [#tpu.dimension_semantics<parallel>], iteration_bounds = array<i64: 2>, scalar_prefetch = 0 : i64, scratch_operands = 0 : i64, tpu.core_type = #tpu.core_type<tc>, window_params = [{transform_indices = @transform_0, window_bounds = array<i64: 32, 32>}, {transform_indices = @transform_1, window_bounds = array<i64: 32, 32>}, {transform_indices = @transform_2, window_bounds = array<i64: 32, 1>}, {pipeline_mode = #tpu.pipeline_mode<synchronous>, transform_indices = @transform_3, window_bounds = array<i64: 32, 2>}, {pipeline_mode = #tpu.pipeline_mode<synchronous>, transform_indices = @transform_4, window_bounds = array<i64: 32, 2>}, {transform_indices = @transform_5, window_bounds = array<i64: 2>}, {pipeline_mode = #tpu.pipeline_mode<synchronous>, transform_indices = @transform_6, window_bounds = array<i64: 32, 32>}, {pipeline_mode = #tpu.pipeline_mode<synchronous>, transform_indices = @transform_7, window_bounds = array<i64: 32, 32>}, {pipeline_mode = #tpu.pipeline_mode<synchronous>, transform_indices = @transform_8, window_bounds = array<i64: 1, 32>}, {transform_indices = @transform_9, window_bounds = array<i64: 32, 32>}]} {
    %c0 = arith.constant 0 : index
    %c0_0 = arith.constant 0 : index
    %0 = vector.load %arg2[%c0, %c0_0] : memref<32x32xf32, #tpu.memory_space<vmem>>, vector<32x32xf32>
    %c0_1 = arith.constant 0 : index
    %c0_2 = arith.constant 0 : index
    %1 = vector.load %arg3[%c0_1, %c0_2] : memref<32x1xf32, #tpu.memory_space<vmem>>, vector<32x1xf32>
    %c0_3 = arith.constant 0 : index
    %c0_4 = arith.constant 0 : index
    %2 = vector.load %arg1[%c0_3, %c0_4] : memref<32x32xf32, #tpu.memory_space<vmem>>, vector<32x32xf32>
    %c0_5 = arith.constant 0 : index
    %c0_6 = arith.constant 0 : index
    %3 = vector.load %arg4[%c0_5, %c0_6] : memref<32x2xf32, #tpu.memory_space<vmem>>, vector<32x2xf32>
    %cst = arith.constant dense<0.000000e+00> : vector<32x2xf32>
    %4 = tpu.matmul %2, %3, %cst {dimension_numbers = #tpu.dot_dimension_numbers<[1], [0], [0], [1], [0, 0, 1, 1], [], []>} : vector<32x32xf32>, vector<32x2xf32>, vector<32x2xf32> -> vector<32x2xf32>
    %c0_7 = arith.constant 0 : index
    %c0_8 = arith.constant 0 : index
    %5 = vector.load %arg5[%c0_7, %c0_8] : memref<32x2xf32, #tpu.memory_space<vmem>>, vector<32x2xf32>
    %cst_9 = arith.constant dense<0.000000e+00> : vector<32x2xf32>
    %6 = tpu.matmul %0, %5, %cst_9 {dimension_numbers = #tpu.dot_dimension_numbers<[1], [0], [0], [1], [0, 0, 1, 1], [], []>} : vector<32x32xf32>, vector<32x2xf32>, vector<32x2xf32> -> vector<32x2xf32>
    %7 = arith.addf %4, %6 : vector<32x2xf32>
    %8 = vector.extract_strided_slice %7 {offsets = [0, 0], sizes = [32, 1], strides = [1, 1]} : vector<32x2xf32> to vector<32x1xf32>
    %c0_10 = arith.constant 0 : index
    %9 = memref.load %arg6[%c0_10] : memref<2xf32, #tpu.memory_space<smem>>
    %10 = vector.broadcast %9 : f32 to vector<32x1xf32>
    %11 = arith.addf %8, %10 : vector<32x1xf32>
    %12 = arith.negf %11 : vector<32x1xf32>
    %13 = math.exp %12 : vector<32x1xf32>
    %cst_11 = arith.constant 1.000000e+00 : f32
    %14 = vector.broadcast %cst_11 : f32 to vector<32x1xf32>
    %15 = arith.addf %14, %13 : vector<32x1xf32>
    %16 = arith.divf %14, %15 : vector<32x1xf32>
    %17 = arith.mulf %1, %16 : vector<32x1xf32>
    %18 = vector.extract_strided_slice %7 {offsets = [0, 1], sizes = [32, 1], strides = [1, 1]} : vector<32x2xf32> to vector<32x1xf32>
    %c1 = arith.constant 1 : index
    %19 = memref.load %arg6[%c1] : memref<2xf32, #tpu.memory_space<smem>>
    %20 = vector.broadcast %19 : f32 to vector<32x1xf32>
    %21 = arith.addf %18, %20 : vector<32x1xf32>
    %22 = arith.negf %21 : vector<32x1xf32>
    %23 = math.exp %22 : vector<32x1xf32>
    %cst_12 = arith.constant 1.000000e+00 : f32
    %24 = vector.broadcast %cst_12 : f32 to vector<32x1xf32>
    %25 = arith.addf %24, %23 : vector<32x1xf32>
    %26 = arith.divf %24, %25 : vector<32x1xf32>
    %c0_13 = arith.constant 0 : index
    %c0_14 = arith.constant 0 : index
    %27 = vector.load %arg7[%c0_13, %c0_14] : memref<32x32xf32, #tpu.memory_space<vmem>>, vector<32x32xf32>
    %cst_15 = arith.constant dense<0.000000e+00> : vector<32x32xf32>
    %28 = tpu.matmul %2, %27, %cst_15 {dimension_numbers = #tpu.dot_dimension_numbers<[1], [0], [0], [1], [0, 0, 1, 1], [], []>} : vector<32x32xf32>, vector<32x32xf32>, vector<32x32xf32> -> vector<32x32xf32>
    %29 = vector.broadcast %26 : vector<32x1xf32> to vector<32x32xf32>
    %30 = arith.mulf %0, %29 : vector<32x32xf32>
    %c0_16 = arith.constant 0 : index
    %c0_17 = arith.constant 0 : index
    %31 = vector.load %arg8[%c0_16, %c0_17] : memref<32x32xf32, #tpu.memory_space<vmem>>, vector<32x32xf32>
    %cst_18 = arith.constant dense<0.000000e+00> : vector<32x32xf32>
    %32 = tpu.matmul %30, %31, %cst_18 {dimension_numbers = #tpu.dot_dimension_numbers<[1], [0], [0], [1], [0, 0, 1, 1], [], []>} : vector<32x32xf32>, vector<32x32xf32>, vector<32x32xf32> -> vector<32x32xf32>
    %33 = arith.addf %28, %32 : vector<32x32xf32>
    %c0_19 = arith.constant 0 : index
    %c0_20 = arith.constant 0 : index
    %34 = vector.load %arg9[%c0_19, %c0_20] : memref<1x32xf32, #tpu.memory_space<vmem>>, vector<1x32xf32>
    %35 = vector.broadcast %34 : vector<1x32xf32> to vector<32x32xf32>
    %36 = arith.addf %33, %35 : vector<32x32xf32>
    %37 = math.tanh %36 : vector<32x32xf32>
    %38 = arith.subf %37, %0 : vector<32x32xf32>
    %39 = vector.broadcast %17 : vector<32x1xf32> to vector<32x32xf32>
    %40 = arith.mulf %39, %38 : vector<32x32xf32>
    %41 = arith.addf %0, %40 : vector<32x32xf32>
    %c0_21 = arith.constant 0 : index
    %c0_22 = arith.constant 0 : index
    %42 = vector.load %arg10[%c0_21, %c0_22] : memref<32x32xf32, #tpu.memory_space<vmem>>, vector<32x32xf32>
    tpu.vector_store %arg10[%c0_21, %c0_22], %41 {strides = array<i32>} : memref<32x32xf32, #tpu.memory_space<vmem>>, vector<32x32xf32>,
    return
  }
  func.func @transform_0(%arg0: i32) -> (i32, i32) {
    %c0_i32 = arith.constant 0 : i32
    %c0_i32_0 = arith.constant 0 : i32
    return %arg0, %c0_i32 : i32, i32
  }
  func.func @transform_1(%arg0: i32) -> (i32, i32) {
    %c0_i32 = arith.constant 0 : i32
    %c0_i32_0 = arith.constant 0 : i32
    return %arg0, %c0_i32 : i32, i32
  }
  func.func @transform_2(%arg0: i32) -> (i32, i32) {
    %c0_i32 = arith.constant 0 : i32
    %c0_i32_0 = arith.constant 0 : i32
    return %arg0, %c0_i32 : i32, i32
  }
  func.func @transform_3(%arg0: i32) -> (i32, i32) {
    %c0_i32 = arith.constant 0 : i32
    %c0_i32_0 = arith.constant 0 : i32
    %c0_i32_1 = arith.constant 0 : i32
    return %c0_i32, %c0_i32_0 : i32, i32
  }
  func.func @transform_4(%arg0: i32) -> (i32, i32) {
    %c0_i32 = arith.constant 0 : i32
    %c0_i32_0 = arith.constant 0 : i32
    %c0_i32_1 = arith.constant 0 : i32
    return %c0_i32, %c0_i32_0 : i32, i32
  }
  func.func @transform_5(%arg0: i32) -> i32 {
    %c0_i32 = arith.constant 0 : i32
    %c0_i32_0 = arith.constant 0 : i32
    return %c0_i32 : i32
  }
  func.func @transform_6(%arg0: i32) -> (i32, i32) {
    %c0_i32 = arith.constant 0 : i32
    %c0_i32_0 = arith.constant 0 : i32
    %c0_i32_1 = arith.constant 0 : i32
    return %c0_i32, %c0_i32_0 : i32, i32
  }
  func.func @transform_7(%arg0: i32) -> (i32, i32) {
    %c0_i32 = arith.constant 0 : i32
    %c0_i32_0 = arith.constant 0 : i32
    %c0_i32_1 = arith.constant 0 : i32
    return %c0_i32, %c0_i32_0 : i32, i32
  }
  func.func @transform_8(%arg0: i32) -> (i32, i32) {
    %c0_i32 = arith.constant 0 : i32
    %c0_i32_0 = arith.constant 0 : i32
    %c0_i32_1 = arith.constant 0 : i32
    return %c0_i32, %c0_i32_0 : i32, i32
  }
  func.func @transform_9(%arg0: i32) -> (i32, i32) {
    %c0_i32 = arith.constant 0 : i32
    %c0_i32_0 = arith.constant 0 : i32
    return %arg0, %c0_i32 : i32, i32
  }
}

</mosaic_0001>

<bundles_post_ra>
// kernel: tpu_custom_call.1
= control target key start
LH: loop header
LB: loop body
LE: loop exit
PB: predicated region body
PF: predicated region fallthrough
CT: control target
= control target key end

     0   :  { %14 = vsyncpa [#allocation3], 0  ;;  %s1346_s30 = smov 0   ;;  %s1507_s0 = inlined_call_operand.vmem [shape: f32[64,32], index: 0, kind: input, shape index: {}]   ;;  %s1508_s1 = inlined_call_operand.vmem [shape: f32[64,32], index: 1, kind: input, shape index: {}]   ;;  %s1509_s2 = inlined_call_operand.vmem [shape: f32[64,1], index: 2, kind: input, shape index: {}]   ;;  %s1510_s3 = inlined_call_operand.vmem [shape: f32[32,2], index: 3, kind: input, shape index: {}]   ;;  %s1511_s4 = inlined_call_operand.vmem [shape: f32[32,2], index: 4, kind: input, shape index: {}]   ;;  %s1512_s5 = inlined_call_operand.vmem [shape: f32[2], index: 5, kind: input, shape index: {}]   ;;  %s1513_s6 = inlined_call_operand.vmem [shape: f32[32,32], index: 6, kind: input, shape index: {}]   ;;  %s1514_s7 = inlined_call_operand.vmem [shape: f32[32,32], index: 7, kind: input, shape index: {}]   ;;  %s1515_s8 = inlined_call_operand.vmem [shape: f32[1,32], index: 8, kind: input, shape index: {}]   ;;  %s1516_s9 = inlined_call_operand.vmem [shape: f32[64,32], index: 9, kind: output, shape index: {}]  }
   0x1 LB: > { %s1030_s10 = sadd.s32 4294967295, %s1291_s30   ;;  %p1032_p0 = scmp.ge.s32.totalorder %s1291_s30, 1  ;;  %s1291_s30 = sphi %s1346_s30, %s20_s30  }
   0x2   : > { %p255_p1 = scmp.lt.s32.totalorder %s1291_s30, 3  ;;  %s274_s13 = sshll.u32 %s1512_s5, 4  ;;  %s275_s13 = int_to_ptr.vmem [resolvable:$true] %s274_s13 }
   0x3   : > { %p1361_p3 = scmp.eq.s32.totalorder %s1030_s10, 0  ;;  %s1266_s16 = scalar_lea.vmem %s275_s13, 16 }
   0x4   : > { %p1357_p2 = pnand %p1032_p0, %p255_p1  ;;  %p1267_p6 = scmp.ne.s32.totalorder %s275_s13, %s1266_s16 }
   0x5   : > { %p1274_p10 = scmp.lt.s32.totalorder %s275_s13, %s275_s13  ;;  %p1275_p11 = scmp.lt.s32.totalorder %s1266_s16, %s1266_s16 }
   0x6   : > { %p1205_p4 = pneg %p1357_p2 }
   0x7   : > { %p1276_p12 = por %p1275_p11, %p1274_p10 }
   0x8   : > { %p1206_p5 = pnand %p1361_p3, %p1205_p4 }
   0xa   : > { %p1268_p7 = pneg %p1206_p5 }
   0xc   : > { %p1269_p8 = pnand %p1268_p7, %p1267_p6 }
   0xe   : > { %p1270_p9 = pneg %p1269_p8 }
  0x10   : > { %p1277_p13 = pnand %p1276_p12, %p1270_p9 }
  0x12   : > { %1280 = shalt.err (!%p1277_p13)
}
  0x13   : > { %s1293_s17 = smov [#allocation2]   ;;  %323 = sbr.rel (%p1357_p2) target bundleno = 668 (0x29c), region = 56 }
  0x14   : > { %1208 = dma.vmem_to_smem (!%p1206_p5), %s275_s13, 16, %s1293_s17, [#allocation3]  }
  0x1a   : > { %1286 = dma.done.wait (%p1361_p3), [#allocation3], 16  }
  0x1b   : > { %1288 = vsyncadd (%p1361_p3), [#allocation3], 4294967280 }
  0x1c   : > { %329 = sfence }
  0x1d   : > { %v410_v0 = vld [vmem:[%s1511_s4] sm:$0xff]  ;;  %v411_v1 = vld [vmem:[%s1511_s4 + $0x8] sm:$0xff]  ;;  %v412_v2 = vld [vmem:[%s1511_s4 + $0x10] sm:$0xff]  ;;  %s1037_s24 = sshll.u32 %s1030_s10, 2  ;;  %vm414_vm0 = vcmask 261120   ;;  %v1294_v20 = vmov 1  }
  0x1e   : > { %v1161_v3 = vpack.c.bf16 %v411_v1, %v410_v0  ;;  %v413_v4 = vld [vmem:[%s1511_s4 + $0x18] sm:$0xff]  ;;  %p371_p0 = scmp.lt.s32.totalorder %s1037_s24, 7  ;;  %v406_v6 = vld [vmem:[%s1510_s3] sm:$0xff]  ;;  %v407_v7 = vld [vmem:[%s1510_s3 + $0x8] sm:$0xff]  ;;  %1222 = vset.pattern.permute.xlu0 %v1294_v20  ;;  %1223 = vset.pattern.permute.xlu1 %v1294_v20  ;;  %s1057_s26 = sld [smem:[#allocation2 + $0x1]] }
  0x1f   : > { %v1165_v5 = vpack.c.bf16 %v413_v4, %v412_v2  ;;  %v1169_v8 = vpack.c.bf16 %v407_v7, %v406_v6  ;;  %v408_v9 = vld [vmem:[%s1510_s3 + $0x10] sm:$0xff]  ;;  %v409_v10 = vld [vmem:[%s1510_s3 + $0x18] sm:$0xff]  ;;  %v701_v21 = vld [vmem:[%s1514_s7] sm:$0xff]  ;;  %s609_s27 = sld [smem:[#allocation2]] }
  0x20   : > { %1162 = vmatprep.subr.bf16.mxu0 %v1161_v3  ;;  %s1520_s24 = smov (!%p371_p0, %s1037_s24), 7  ;;  %v1173_v14 = vpack.c.bf16 %v409_v10, %v408_v9  ;;  %v702_v22 = vld [vmem:[%s1514_s7 + $0x8] sm:$0xff]  ;;  %v703_v63 = vld [vmem:[%s1514_s7 + $0x10] sm:$0xff]  ;;  %v704_v0 = vld [vmem:[%s1514_s7 + $0x18] sm:$0xff] }
  0x21   : > { %1164 = vmatpush3.bf16.msra.mxu0 %v1161_v3  ;;  %s1393_s10 = sshll.u32 %s1520_s24, 3  ;;  %v1177_v23 = vpack.c.bf16 %v702_v22, %v701_v21  ;;  %v1181_v1 = vpack.c.bf16 %v704_v0, %v703_v63  ;;  %v673_v4 = vld [vmem:[%s1513_s6] sm:$0xff]  ;;  %v1295_v21 = vmov 0  }
  0x22   : > { %1166 = vmatprep.subr.bf16.mxu0 %v1165_v5  ;;  %s380_s14 = scalar_lea.vmem %s1508_s1, %s1393_s10  ;;  %s374_s21 = scalar_lea.vmem %s1507_s0, %s1393_s10 }
  0x23   : > { %v1405_v11 = vld [vmem:[%s380_s14] sm:$0xff]  ;;  %v1409_v12 = vld [vmem:[%s380_s14 + $0x8] sm:$0xff]  ;;  %v1411_v13 = vld [vmem:[%s380_s14 + $0x10] sm:$0xff]  ;;  %1178 = vmatprep.subr.bf16.mxu1 %v1177_v23  ;;  %s386_s15 = scalar_lea.vmem %s1509_s2, %s1393_s10  ;;  %s392_s28 = scalar_lea.vmem %s1516_s9, %s1393_s10 }
  0x24   : > { %1113 = vmatprep.mubr.msk.f32.mxu0 %vm414_vm0, %v1405_v11  ;;  %v1421_v15 = vld [vmem:[%s380_s14 + $0x18] sm:$0xff]  ;;  %v1423_v16 = vld [vmem:[%s374_s21] sm:$0xff]  ;;  %v1429_v17 = vld [vmem:[%s374_s21 + $0x8] sm:$0xff]  ;;  %1180 = vmatpush3.bf16.msra.mxu1 %v1177_v23  ;;  %v644_v24 = vstv %s1057_s26 }
  0x25   : > { %1168 = vmatpush3.bf16.msra.mxu0 %v1165_v5  ;;  %v1431_v18 = vld [vmem:[%s374_s21 + $0x10] sm:$0xff]  ;;  %v1437_v19 = vld [vmem:[%s374_s21 + $0x18] sm:$0xff]  ;;  %v610_v25 = vstv %s609_s27  ;;  %1182 = vmatprep.subr.bf16.mxu1 %v1181_v1  ;;  %v674_v5 = vld [vmem:[%s1513_s6 + $0x8] sm:$0xff] }
  0x26   : > { %1170 = vmatprep.subr.bf16.mxu0 %v1169_v8  ;;  %v398_v7 = vld [vmem:[%s386_s15] sm:$0xff]  ;;  %v401_v22 = vld [vmem:[%s386_s15 + $0x18] sm:$0xff]  ;;  %v399_v23 = vld [vmem:[%s386_s15 + $0x8] sm:$0xff] }
  0x28   : > { %1114 = vmatmul.mubr.msk.f32.vlgmr.msra.gmra.mrb[0].mxu0 %vm414_vm0, %v1409_v12  ;;  %1184 = vmatpush3.bf16.msra.mxu1 %v1181_v1 }
  0x29   : > { %1172 = vmatpush3.bf16.msra.mxu0 %v1169_v8  ;;  %1116 = vmatprep.mubr.msk.f32.mxu0 %vm414_vm0, %v1411_v13  ;;  %v1185_v8 = vpack.c.bf16 %v674_v5, %v673_v4 }
  0x2a   : > { %1174 = vmatprep.subr.bf16.mxu0 %v1173_v14 }
  0x2b   : > { %1186 = vmatprep.subr.bf16.mxu1 %v1185_v8 }
  0x2c   : > { %1117 = vmatmul.mubr.msk.f32.gmra.mrb[2].mxu0 %vm414_vm0, %v1421_v15 }
  0x2d   : > { %1176 = vmatpush3.bf16.msra.mxu0 %v1173_v14  ;;  %1127 = vmatprep.mubr.msk.f32.mxu0 %vm414_vm0, %v1423_v16 }
  0x30   : > { %1128 = vmatmul.mubr.msk.f32.vlgmr.msra.gmra.mrb[0].mxu0 %vm414_vm0, %v1429_v17 }
  0x31   : > { %1130 = vmatprep.mubr.msk.f32.mxu0 %vm414_vm0, %v1431_v18 }
  0x34   : > { %1131 = vmatmul.mubr.msk.f32.gmra.mrb[2].mxu0 %vm414_vm0, %v1437_v19 }
 0x103   : > { %v1129_v26 = vpop.f32.mrb[0].mxu0 }
 0x104   : > { %v646_v27 = vadd.f32 %v1129_v26, %v644_v24  ;;  %v590_v28 = vpop.f32.mrb[1].mxu0  ;;  %v612_v29 = vadd.f32 %v1129_v26, %v610_v25 }
 0x105   : > { %v611_v30 = vadd.f32 %v610_v25, %v590_v28  ;;  %v645_v31 = vadd.f32 %v644_v24, %v590_v28 }
 0x106   : > { %v1059_v32 = vmul.f32 -1.442695, %v646_v27  ;;  %v1054_v39 = vmul.f32 -1.442695, %v612_v29  ;;  %v400_v27 = vld [vmem:[%s386_s15 + $0x10] sm:$0xff] }
 0x107   : > { %v1058_v33 = vmul.f32 -1.442695, %v645_v31  ;;  %v1132_v34 = vpop.f32.mrb[2].mxu0  ;;  %v1053_v35 = vmul.f32 -1.442695, %v611_v30  ;;  %v675_v31 = vld [vmem:[%s1513_s6 + $0x10] sm:$0xff] }
 0x108   : > { %v614_v36 = vadd.f32 %v1132_v34, %v610_v25  ;;  %v648_v37 = vadd.f32 %v1132_v34, %v644_v24  ;;  %v600_v38 = vpop.f32.mrb[3].mxu0  ;;  %1226 = vpow2.f32 %v1059_v32  ;;  %v676_v32 = vld [vmem:[%s1513_s6 + $0x18] sm:$0xff] }
 0x109   : > { %v647_v40 = vadd.f32 %v644_v24, %v600_v38  ;;  %1228 = vpow2.f32 %v1058_v33  ;;  %v613_v44 = vadd.f32 %v610_v25, %v600_v38 }
 0x10a   : > { %v1061_v41 = vmul.f32 -1.442695, %v648_v37  ;;  %1230 = vpow2.f32 %v1053_v35  ;;  %v1056_v43 = vmul.f32 -1.442695, %v614_v36  ;;  %v1189_v37 = vpack.c.bf16 %v676_v32, %v675_v31 }
 0x10b   : > { %v1060_v42 = vmul.f32 -1.442695, %v647_v40  ;;  %1232 = vpow2.f32 %v1054_v39  ;;  %v1055_v45 = vmul.f32 -1.442695, %v613_v44  ;;  %v1070_v40 = vld [vmem:[%s1515_s8] ss:$0 sm:$0xff] }
 0x10c   : > { %1234 = vpow2.f32 %v1061_v41 }
 0x10d   : > { %1236 = vpow2.f32 %v1060_v42 }
 0x10e   : > { %1238 = vpow2.f32 %v1056_v43 }
 0x10f   : > { %1240 = vpow2.f32 %v1055_v45 }
 0x112   : > { %v1227_v46 = vpop.eup %1226 }
 0x113   : > { %v1229_v47 = vpop.eup %1228  ;;  %v662_v51 = vadd.f32 1.0, %v1227_v46 }
 0x114   : > { %v1231_v48 = vpop.eup %1230  ;;  %v661_v49 = vadd.f32 1.0, %v1229_v47 }
 0x115   : > { %v1233_v50 = vpop.eup %1232  ;;  %v627_v54 = vadd.f32 1.0, %v1231_v48 }
 0x116   : > { %v1235_v52 = vpop.eup %1234  ;;  %1242 = vrcp.f32 %v661_v49  ;;  %v628_v57 = vadd.f32 1.0, %v1233_v50 }
 0x117   : > { %v1237_v53 = vpop.eup %1236  ;;  %1244 = vrcp.f32 %v662_v51  ;;  %v664_v58 = vadd.f32 1.0, %v1235_v52 }
 0x118   : > { %v1239_v55 = vpop.eup %1238  ;;  %v663_v56 = vadd.f32 1.0, %v1237_v53 }
 0x119   : > { %v630_v59 = vadd.f32 1.0, %v1239_v55  ;;  %v1241_v60 = vpop.eup %1240 }
 0x11a   : > { %1246 = vrcp.f32 %v663_v56  ;;  %v629_v61 = vadd.f32 1.0, %v1241_v60 }
 0x11b   : > { %1248 = vrcp.f32 %v627_v54 }
 0x11c   : > { %1250 = vrcp.f32 %v628_v57 }
 0x11d   : > { %1252 = vrcp.f32 %v664_v58 }
 0x11e   : > { %1254 = vrcp.f32 %v630_v59 }
 0x11f   : > { %1256 = vrcp.f32 %v629_v61 }
 0x120   : > { %v1243_v62 = vpop.eup %1242 }
 0x121   : > { %679 = vperm.xlu0 %1222, %v1243_v62   ;;  %v1245_v2 = vpop.eup %1244 }
 0x124   : > { %v1247_v3 = vpop.eup %1246 }
 0x125   : > { %v1249_v6 = vpop.eup %1248  ;;  %684 = vperm.xlu0 %1222, %v1245_v2   ;;  %689 = vperm.xlu1 %1223, %v1247_v3  }
 0x126   : > { %v1251_v9 = vpop.eup %1250  ;;  %v639_v14 = vmul.f32 %v1249_v6, %v398_v7 }
 0x127   : > { %v1253_v10 = vpop.eup %1252  ;;  %v640_v25 = vmul.f32 %v1251_v9, %v399_v23 }
 0x128   : > { %v1255_v20 = vpop.eup %1254 }
 0x129   : > { %1224 = vset.pattern.permute.xlu0 %v1295_v21  ;;  %694 = vperm.xlu1 %1223, %v1253_v10   ;;  %v642_v24 = vmul.f32 %v1255_v20, %v401_v22  ;;  %v1257_v26 = vpop.eup %1256 }
 0x12a   : > { %908 = vperm.xlu0 %1224, %v639_v14   ;;  %v641_v28 = vmul.f32 %v1257_v26, %v400_v27 }
 0x12d   : > { %1225 = vset.pattern.permute.xlu1 %v1295_v21 }
 0x12e   : > { %923 = vperm.xlu0 %1224, %v642_v24   ;;  %913 = vperm.xlu1 %1225, %v640_v25  }
 0x132   : > { %918 = vperm.xlu1 %1225, %v641_v28  }
 0x1a0   : > { %v680_v29 = vpop.permute.xlu0 %679 }
 0x1a1   : > { %v697_v30 = vmul.f32 %v680_v29, %v1405_v11 }
 0x1a3   : > { %1141 = vmatprep.mubr.msk.f32.mxu1 %vm414_vm0, %v697_v30 }
 0x1a4   : > { %v685_v33 = vpop.permute.xlu0 %684  ;;  %v690_v34 = vpop.permute.xlu1 %689 }
 0x1a5   : > { %v698_v35 = vmul.f32 %v685_v33, %v1409_v12  ;;  %v699_v36 = vmul.f32 %v690_v34, %v1411_v13 }
 0x1a7   : > { %1142 = vmatmul.mubr.msk.f32.vlgmr.msra.gmra.mrb[0].mxu1 %vm414_vm0, %v698_v35 }
 0x1a8   : > { %1144 = vmatprep.mubr.msk.f32.mxu1 %vm414_vm0, %v699_v36  ;;  %1188 = vmatpush3.bf16.msra.mxu1 %v1185_v8  ;;  %v695_v38 = vpop.permute.xlu1 %694 }
 0x1a9   : > { %v700_v39 = vmul.f32 %v695_v38, %v1421_v15  ;;  %1190 = vmatprep.subr.bf16.mxu1 %v1189_v37  ;;  %v909_v47 = vpop.permute.xlu0 %908 }
 0x1ab   : > { %1145 = vmatmul.mubr.msk.f32.gmra.mrb[2].mxu1 %vm414_vm0, %v700_v39 }
 0x1ac   : > { %1192 = vmatpush3.bf16.msra.mxu1 %v1189_v37  ;;  %1155 = vmatprep.mubr.msk.f32.mxu1 %vm414_vm0, %v1423_v16 }
 0x1ad   : > { %v914_v48 = vpop.permute.xlu1 %913  ;;  %v924_v56 = vpop.permute.xlu0 %923 }
 0x1af   : > { %1156 = vmatmul.mubr.msk.f32.vlgmr.msra.gmra.mrb[0].mxu1 %vm414_vm0, %v1429_v17 }
 0x1b0   : > { %1158 = vmatprep.mubr.msk.f32.mxu1 %vm414_vm0, %v1431_v18 }
 0x1b1   : > { %v919_v59 = vpop.permute.xlu1 %918 }
 0x1b3   : > { %1159 = vmatmul.mubr.msk.f32.gmra.mrb[2].mxu1 %vm414_vm0, %v1437_v19 }
 0x282   : > { %v1157_v41 = vpop.f32.mrb[0].mxu1 }
 0x283   : > { %v895_v42 = vadd.f32 %v1157_v41, %v1070_v40  ;;  %v868_v43 = vpop.f32.mrb[1].mxu1 }
 0x284   : > { %v894_v44 = vadd.f32 %v1070_v40, %v868_v43 }
 0x285   : > { %1258 = vtanh.f32 %v895_v42 }
 0x286   : > { %1260 = vtanh.f32 %v894_v44  ;;  %v1160_v16 = vpop.f32.mrb[2].mxu1 }
 0x287   : > { %v897_v45 = vadd.f32 %v1160_v16, %v1070_v40  ;;  %v878_v17 = vpop.f32.mrb[3].mxu1 }
 0x288   : > { %v896_v46 = vadd.f32 %v1070_v40, %v878_v17 }
 0x289   : > { %1262 = vtanh.f32 %v897_v45 }
 0x28a   : > { %1264 = vtanh.f32 %v896_v46 }
 0x28f   : > { %v1259_v18 = vpop.eup %1258 }
 0x290   : > { %v1261_v19 = vpop.eup %1260  ;;  %v903_v49 = vsub.f32 %v1259_v18, %v1409_v12 }
 0x291   : > { %v902_v50 = vsub.f32 %v1261_v19, %v1405_v11 }
 0x292   : > { %v927_v51 = vmul.f32 %v914_v48, %v903_v49 }
 0x293   : > { %v1263_v52 = vpop.eup %1262  ;;  %v926_v53 = vmul.f32 %v909_v47, %v902_v50 }
 0x294   : > { %v1265_v54 = vpop.eup %1264  ;;  %v905_v55 = vsub.f32 %v1263_v52, %v1421_v15  ;;  %v931_v60 = vadd.f32 %v927_v51, %v1409_v12 }
 0x295   : > { %v930_v57 = vadd.f32 %v926_v53, %v1405_v11  ;;  %v904_v58 = vsub.f32 %v1265_v54, %v1411_v13 }
 0x296   : > { %v929_v61 = vmul.f32 %v924_v56, %v905_v55  ;;  %935 = vst.msk [vmem:[%s392_s28 + $0x8] sm:$0xff] %vm414_vm0, %v931_v60 }
 0x297   : > { %934 = vst.msk [vmem:[%s392_s28] sm:$0xff] %vm414_vm0, %v930_v57  ;;  %v928_v62 = vmul.f32 %v919_v59, %v904_v58 }
 0x298   : > { %v933_v0 = vadd.f32 %v929_v61, %v1421_v15 }
 0x299   : > { %v932_v63 = vadd.f32 %v928_v62, %v1411_v13 }
 0x29a   : > { %937 = vst.msk [vmem:[%s392_s28 + $0x18] sm:$0xff] %vm414_vm0, %v933_v0 }
 0x29b   : > { %936 = vst.msk [vmem:[%s392_s28 + $0x10] sm:$0xff] %vm414_vm0, %v932_v63 }
 0x29c PF: > { %s20_s30 = sadd.s32 1, %s1291_s30  }
 0x29d   : > { %p17_p1 = scmp.ge.s32.totalorder %s20_s30, 4  }
 0x29f   :  { %19 = sbr.rel (!%p17_p1) target bundleno = 1 (0x1), region = 97 }
 0x2a6   :  { %960 = vsyncpa [#allocation3], 1 }
 0x2a7   :  { %962 = vsyncpa [#allocation3 + $0x1], 1 }

</bundles_post_ra>
